<compile_context>
chip_gen: v5e
topology: v5e:2x2
jax: 0.10.0
libtpu: 0.0.40
codegen_flags: <defaults>
</compile_context>

<pallas_src>
import functools
import math

import jax
import jax.numpy as jnp
from jax.experimental import pallas as pl
from jax.experimental.pallas import tpu as pltpu


def _mha_kernel(q_ref, k_ref, v_ref,
                wq_ref, bq_ref, wk_ref, bk_ref, wv_ref, bv_ref,
                wm_ref, bm_ref, o_ref, *, batch, seq, d_k):
    """Single-step kernel.  Activations arrive with B and S collapsed:
    q/k/v refs are (B*S, D); weights are (D, d_hidden) / (d_hidden, D)."""
    inv_scale = 1.0 / math.sqrt(d_k)
    f32 = jnp.float32

    # Input projections over all B*S rows at once (one MXU matmul each,
    # M = 16 rows -> fully packed sublanes), f32 operands, f32 accumulation.
    proj_q = jnp.dot(q_ref[...], wq_ref[...], preferred_element_type=f32) + bq_ref[...]
    proj_k = jnp.dot(k_ref[...], wk_ref[...], preferred_element_type=f32) + bk_ref[...]
    proj_v = jnp.dot(v_ref[...], wv_ref[...], preferred_element_type=f32) + bv_ref[...]

    # Scaled dot-product attention is per-batch; B is tiny, so a statically
    # unrolled loop over sublane-aligned (S, d_hidden) slices is cheapest.
    attn_blocks = []
    for b in range(batch):
        lo, hi = b * seq, (b + 1) * seq
        qb = proj_q[lo:hi, :]
        kb = proj_k[lo:hi, :]
        vb = proj_v[lo:hi, :]

        # Contract on the last dims (no materialized K transpose).
        scores = jax.lax.dot_general(
            qb, kb, dimension_numbers=(((1,), (1,)), ((), ())),
            preferred_element_type=f32) * inv_scale            # (S, S)

        # Exact, numerically stable softmax along the key axis (f32).
        m = jnp.max(scores, axis=-1, keepdims=True)
        e = jnp.exp(scores - m)
        p = e / jnp.sum(e, axis=-1, keepdims=True)

        attn_blocks.append(
            jnp.dot(p, vb, preferred_element_type=f32))        # (S, d_hidden)

    attn = jnp.concatenate(attn_blocks, axis=0)                # (B*S, d_hidden)

    # Output projection over all B*S rows at once.
    out = jnp.dot(attn, wm_ref[...], preferred_element_type=f32) + bm_ref[...]
    o_ref[...] = out.astype(o_ref.dtype)                       # (B*S, D)


def prepare_params(wq, bq, wk, bk, wv, bv, wm, bm):
    """One-time parameter preparation (hoisted OUT of the per-call path):
    transpose nn.Linear (out, in) weights to (in, out) and reshape biases to
    (1, out) rows.  Everything stays f32."""
    f32 = jnp.float32
    return {
        "wq_t": jnp.asarray(wq.T, f32), "bq": jnp.asarray(bq, f32).reshape(1, -1),
        "wk_t": jnp.asarray(wk.T, f32), "bk": jnp.asarray(bk, f32).reshape(1, -1),
        "wv_t": jnp.asarray(wv.T, f32), "bv": jnp.asarray(bv, f32).reshape(1, -1),
        "wm_t": jnp.asarray(wm.T, f32), "bm": jnp.asarray(bm, f32).reshape(1, -1),
    }


@functools.partial(jax.jit, static_argnames=("d_k",))
def multi_head_attention(q, k, v, params, *, d_k):
    """q, k, v: (B, S, D) float32.  params: dict from prepare_params."""
    B, S, D = q.shape

    # Collapse batch and sequence for the Linear matmuls (free reshape of a
    # contiguous array; fused into the same jit executable).
    q2 = q.reshape(B * S, D)
    k2 = k.reshape(B * S, D)
    v2 = v.reshape(B * S, D)

    kernel = functools.partial(_mha_kernel, batch=B, seq=S, d_k=d_k)
    vmem = pl.BlockSpec(memory_space=pltpu.MemorySpace.VMEM)  # whole array in VMEM

    out = pl.pallas_call(
        kernel,
        out_shape=jax.ShapeDtypeStruct((B * S, D), q.dtype),
        in_specs=[vmem] * 11,
        out_specs=vmem,
    )(q2, k2, v2,
      params["wq_t"], params["bq"],
      params["wk_t"], params["bk"],
      params["wv_t"], params["bv"],
      params["wm_t"], params["bm"])

    return out.reshape(B, S, D)


def _reference(q, k, v, params, *, d_k):
    """Exact f32 reference matching the PyTorch module's forward
    (HIGHEST matmul precision so the reference itself is not the error source)."""
    hp = jax.lax.Precision.HIGHEST
    proj_q = jnp.einsum("bsd,dh->bsh", q, params["wq_t"], precision=hp) + params["bq"][0]
    proj_k = jnp.einsum("bsd,dh->bsh", k, params["wk_t"], precision=hp) + params["bk"][0]
    proj_v = jnp.einsum("bsd,dh->bsh", v, params["wv_t"], precision=hp) + params["bv"][0]
    scores = jnp.einsum("bqh,bkh->bqk", proj_q, proj_k, precision=hp) / math.sqrt(d_k)
    p = jax.nn.softmax(scores, axis=-1)
    attn = jnp.einsum("bqk,bkh->bqh", p, proj_v, precision=hp)
    return jnp.einsum("bqh,hd->bqd", attn, params["wm_t"], precision=hp) + params["bm"][0]


if __name__ == "__main__":
    # Module hyperparameters (small, consistent with the forward pass).
    d_model = 32
    n_heads = 8
    d_k = d_model // n_heads          # 4
    d_v = d_model // n_heads          # 4
    d_hidden = d_model * d_k          # 128

    B, S = 2, 8

    key = jax.random.PRNGKey(0)
    keys = jax.random.split(key, 11)

    def linear_init(kw, kb, in_f, out_f):
        # Deterministic nn.Linear-style init: U(-1/sqrt(in), 1/sqrt(in)).
        bound = 1.0 / math.sqrt(in_f)
        w = jax.random.uniform(kw, (out_f, in_f), jnp.float32, -bound, bound)
        b = jax.random.uniform(kb, (out_f,), jnp.float32, -bound, bound)
        return w, b

    wq, bq = linear_init(keys[0], keys[1], d_model, d_hidden)
    wk, bk = linear_init(keys[2], keys[3], d_model, d_hidden)
    wv, bv = linear_init(keys[4], keys[5], d_model, d_model * d_v)
    wm, bm = linear_init(keys[6], keys[7], d_model * d_v, d_model)

    # One-time parameter prep (NOT part of the per-call path).
    params = prepare_params(wq, bq, wk, bk, wv, bv, wm, bm)
    params = jax.block_until_ready(params)

    q = jax.random.normal(keys[8], (B, S, d_model), jnp.float32)
    k = jax.random.normal(keys[9], (B, S, d_model), jnp.float32)
    v = jax.random.normal(keys[10], (B, S, d_model), jnp.float32)

    out = multi_head_attention(q, k, v, params, d_k=d_k)
    out = jax.block_until_ready(out)
    assert out.shape == (B, S, d_model)

    # All-f32 kernel now checks against the exact module semantics at a much
    # tighter tolerance than the old bf16 path.
    ref = _reference(q, k, v, params, d_k=d_k)
    assert jnp.allclose(out, ref, atol=2e-2, rtol=2e-2), \
        "mismatch vs f32 reference"

    print("KERNEL_OK")
</pallas_src>

<mosaic_0001>
module attributes {stable_mosaic.version = 11 : i64} {
  func.func @_mha_kernel(%arg0: memref<16x32xf32, #tpu.memory_space<vmem>>, %arg1: memref<16x32xf32, #tpu.memory_space<vmem>>, %arg2: memref<16x32xf32, #tpu.memory_space<vmem>>, %arg3: memref<32x128xf32, #tpu.memory_space<vmem>>, %arg4: memref<1x128xf32, #tpu.memory_space<vmem>>, %arg5: memref<32x128xf32, #tpu.memory_space<vmem>>, %arg6: memref<1x128xf32, #tpu.memory_space<vmem>>, %arg7: memref<32x128xf32, #tpu.memory_space<vmem>>, %arg8: memref<1x128xf32, #tpu.memory_space<vmem>>, %arg9: memref<128x32xf32, #tpu.memory_space<vmem>>, %arg10: memref<1x32xf32, #tpu.memory_space<vmem>>, %arg11: memref<16x32xf32, #tpu.memory_space<vmem>>) attributes {dimension_semantics = [], scalar_prefetch = 0 : i64, scratch_operands = 0 : i64, tpu.core_type = #tpu.core_type<tc>} {
    %c0 = arith.constant 0 : index
    %c0_0 = arith.constant 0 : index
    %0 = vector.load %arg0[%c0, %c0_0] : memref<16x32xf32, #tpu.memory_space<vmem>>, vector<16x32xf32>
    %c0_1 = arith.constant 0 : index
    %c0_2 = arith.constant 0 : index
    %1 = vector.load %arg3[%c0_1, %c0_2] : memref<32x128xf32, #tpu.memory_space<vmem>>, vector<32x128xf32>
    %cst = arith.constant dense<0.000000e+00> : vector<16x128xf32>
    %2 = tpu.matmul %0, %1, %cst {dimension_numbers = #tpu.dot_dimension_numbers<[1], [0], [0], [1], [0, 0, 1, 1], [], []>} : vector<16x32xf32>, vector<32x128xf32>, vector<16x128xf32> -> vector<16x128xf32>
    %c0_3 = arith.constant 0 : index
    %c0_4 = arith.constant 0 : index
    %3 = vector.load %arg4[%c0_3, %c0_4] : memref<1x128xf32, #tpu.memory_space<vmem>>, vector<1x128xf32>
    %4 = vector.broadcast %3 : vector<1x128xf32> to vector<16x128xf32>
    %5 = arith.addf %2, %4 : vector<16x128xf32>
    %c0_5 = arith.constant 0 : index
    %c0_6 = arith.constant 0 : index
    %6 = vector.load %arg1[%c0_5, %c0_6] : memref<16x32xf32, #tpu.memory_space<vmem>>, vector<16x32xf32>
    %c0_7 = arith.constant 0 : index
    %c0_8 = arith.constant 0 : index
    %7 = vector.load %arg5[%c0_7, %c0_8] : memref<32x128xf32, #tpu.memory_space<vmem>>, vector<32x128xf32>
    %cst_9 = arith.constant dense<0.000000e+00> : vector<16x128xf32>
    %8 = tpu.matmul %6, %7, %cst_9 {dimension_numbers = #tpu.dot_dimension_numbers<[1], [0], [0], [1], [0, 0, 1, 1], [], []>} : vector<16x32xf32>, vector<32x128xf32>, vector<16x128xf32> -> vector<16x128xf32>
    %c0_10 = arith.constant 0 : index
    %c0_11 = arith.constant 0 : index
    %9 = vector.load %arg6[%c0_10, %c0_11] : memref<1x128xf32, #tpu.memory_space<vmem>>, vector<1x128xf32>
    %10 = vector.broadcast %9 : vector<1x128xf32> to vector<16x128xf32>
    %11 = arith.addf %8, %10 : vector<16x128xf32>
    %c0_12 = arith.constant 0 : index
    %c0_13 = arith.constant 0 : index
    %12 = vector.load %arg2[%c0_12, %c0_13] : memref<16x32xf32, #tpu.memory_space<vmem>>, vector<16x32xf32>
    %c0_14 = arith.constant 0 : index
    %c0_15 = arith.constant 0 : index
    %13 = vector.load %arg7[%c0_14, %c0_15] : memref<32x128xf32, #tpu.memory_space<vmem>>, vector<32x128xf32>
    %cst_16 = arith.constant dense<0.000000e+00> : vector<16x128xf32>
    %14 = tpu.matmul %12, %13, %cst_16 {dimension_numbers = #tpu.dot_dimension_numbers<[1], [0], [0], [1], [0, 0, 1, 1], [], []>} : vector<16x32xf32>, vector<32x128xf32>, vector<16x128xf32> -> vector<16x128xf32>
    %c0_17 = arith.constant 0 : index
    %c0_18 = arith.constant 0 : index
    %15 = vector.load %arg8[%c0_17, %c0_18] : memref<1x128xf32, #tpu.memory_space<vmem>>, vector<1x128xf32>
    %16 = vector.broadcast %15 : vector<1x128xf32> to vector<16x128xf32>
    %17 = arith.addf %14, %16 : vector<16x128xf32>
    %18 = vector.extract_strided_slice %5 {offsets = [0, 0], sizes = [8, 128], strides = [1, 1]} : vector<16x128xf32> to vector<8x128xf32>
    %19 = vector.extract_strided_slice %11 {offsets = [0, 0], sizes = [8, 128], strides = [1, 1]} : vector<16x128xf32> to vector<8x128xf32>
    %20 = vector.extract_strided_slice %17 {offsets = [0, 0], sizes = [8, 128], strides = [1, 1]} : vector<16x128xf32> to vector<8x128xf32>
    %cst_19 = arith.constant dense<0.000000e+00> : vector<8x8xf32>
    %21 = tpu.matmul %18, %19, %cst_19 {dimension_numbers = #tpu.dot_dimension_numbers<[1], [1], [0], [0], [0, 0, 1, 0], [], []>} : vector<8x128xf32>, vector<8x128xf32>, vector<8x8xf32> -> vector<8x8xf32>
    %cst_20 = arith.constant 5.000000e-01 : f32
    %22 = vector.broadcast %cst_20 : f32 to vector<8x8xf32>
    %23 = arith.mulf %21, %22 : vector<8x8xf32>
    %cst_21 = arith.constant dense<0xFF800000> : vector<8xf32>
    %24 = vector.multi_reduction <maximumf>, %23, %cst_21 [1] : vector<8x8xf32> to vector<8xf32>
    %25 = vector.shape_cast %24 : vector<8xf32> to vector<8x1xf32>
    %26 = vector.broadcast %25 : vector<8x1xf32> to vector<8x8xf32>
    %27 = arith.subf %23, %26 : vector<8x8xf32>
    %28 = math.exp %27 : vector<8x8xf32>
    %cst_22 = arith.constant dense<0.000000e+00> : vector<8xf32>
    %29 = vector.multi_reduction <add>, %28, %cst_22 [1] : vector<8x8xf32> to vector<8xf32>
    %30 = vector.shape_cast %29 : vector<8xf32> to vector<8x1xf32>
    %31 = vector.broadcast %30 : vector<8x1xf32> to vector<8x8xf32>
    %32 = arith.divf %28, %31 : vector<8x8xf32>
    %cst_23 = arith.constant dense<0.000000e+00> : vector<8x128xf32>
    %33 = tpu.matmul %32, %20, %cst_23 {dimension_numbers = #tpu.dot_dimension_numbers<[1], [0], [0], [1], [0, 0, 1, 1], [], []>} : vector<8x8xf32>, vector<8x128xf32>, vector<8x128xf32> -> vector<8x128xf32>
    %34 = vector.extract_strided_slice %5 {offsets = [8, 0], sizes = [8, 128], strides = [1, 1]} : vector<16x128xf32> to vector<8x128xf32>
    %35 = vector.extract_strided_slice %11 {offsets = [8, 0], sizes = [8, 128], strides = [1, 1]} : vector<16x128xf32> to vector<8x128xf32>
    %36 = vector.extract_strided_slice %17 {offsets = [8, 0], sizes = [8, 128], strides = [1, 1]} : vector<16x128xf32> to vector<8x128xf32>
    %cst_24 = arith.constant dense<0.000000e+00> : vector<8x8xf32>
    %37 = tpu.matmul %34, %35, %cst_24 {dimension_numbers = #tpu.dot_dimension_numbers<[1], [1], [0], [0], [0, 0, 1, 0], [], []>} : vector<8x128xf32>, vector<8x128xf32>, vector<8x8xf32> -> vector<8x8xf32>
    %cst_25 = arith.constant 5.000000e-01 : f32
    %38 = vector.broadcast %cst_25 : f32 to vector<8x8xf32>
    %39 = arith.mulf %37, %38 : vector<8x8xf32>
    %cst_26 = arith.constant dense<0xFF800000> : vector<8xf32>
    %40 = vector.multi_reduction <maximumf>, %39, %cst_26 [1] : vector<8x8xf32> to vector<8xf32>
    %41 = vector.shape_cast %40 : vector<8xf32> to vector<8x1xf32>
    %42 = vector.broadcast %41 : vector<8x1xf32> to vector<8x8xf32>
    %43 = arith.subf %39, %42 : vector<8x8xf32>
    %44 = math.exp %43 : vector<8x8xf32>
    %cst_27 = arith.constant dense<0.000000e+00> : vector<8xf32>
    %45 = vector.multi_reduction <add>, %44, %cst_27 [1] : vector<8x8xf32> to vector<8xf32>
    %46 = vector.shape_cast %45 : vector<8xf32> to vector<8x1xf32>
    %47 = vector.broadcast %46 : vector<8x1xf32> to vector<8x8xf32>
    %48 = arith.divf %44, %47 : vector<8x8xf32>
    %cst_28 = arith.constant dense<0.000000e+00> : vector<8x128xf32>
    %49 = tpu.matmul %48, %36, %cst_28 {dimension_numbers = #tpu.dot_dimension_numbers<[1], [0], [0], [1], [0, 0, 1, 1], [], []>} : vector<8x8xf32>, vector<8x128xf32>, vector<8x128xf32> -> vector<8x128xf32>
    %50 = tpu.concatenate %33, %49 in 0 : vector<8x128xf32>, vector<8x128xf32> -> vector<16x128xf32>
    %c0_29 = arith.constant 0 : index
    %c0_30 = arith.constant 0 : index
    %51 = vector.load %arg9[%c0_29, %c0_30] : memref<128x32xf32, #tpu.memory_space<vmem>>, vector<128x32xf32>
    %cst_31 = arith.constant dense<0.000000e+00> : vector<16x32xf32>
    %52 = tpu.matmul %50, %51, %cst_31 {dimension_numbers = #tpu.dot_dimension_numbers<[1], [0], [0], [1], [0, 0, 1, 1], [], []>} : vector<16x128xf32>, vector<128x32xf32>, vector<16x32xf32> -> vector<16x32xf32>
    %c0_32 = arith.constant 0 : index
    %c0_33 = arith.constant 0 : index
    %53 = vector.load %arg10[%c0_32, %c0_33] : memref<1x32xf32, #tpu.memory_space<vmem>>, vector<1x32xf32>
    %54 = vector.broadcast %53 : vector<1x32xf32> to vector<16x32xf32>
    %55 = arith.addf %52, %54 : vector<16x32xf32>
    %c0_34 = arith.constant 0 : index
    %c0_35 = arith.constant 0 : index
    %56 = vector.load %arg11[%c0_34, %c0_35] : memref<16x32xf32, #tpu.memory_space<vmem>>, vector<16x32xf32>
    tpu.vector_store %arg11[%c0_34, %c0_35], %55 {strides = array<i32>} : memref<16x32xf32, #tpu.memory_space<vmem>>, vector<16x32xf32>,
    return
  }
}

</mosaic_0001>

<bundles_post_ra>
// kernel: multi_head_attention.1
= control target key start
LH: loop header
LB: loop body
LE: loop exit
PB: predicated region body
PF: predicated region fallthrough
CT: control target
= control target key end

     0   :  { %s608_s0 = inlined_call_operand.vmem [shape: f32[16,32], index: 0, kind: input, shape index: {}]   ;;  %s609_s1 = inlined_call_operand.vmem [shape: f32[16,32], index: 1, kind: input, shape index: {}]   ;;  %s610_s2 = inlined_call_operand.vmem [shape: f32[16,32], index: 2, kind: input, shape index: {}]   ;;  %s611_s3 = inlined_call_operand.vmem [shape: f32[32,128], index: 3, kind: input, shape index: {}]   ;;  %s612_s4 = inlined_call_operand.vmem [shape: f32[1,128], index: 4, kind: input, shape index: {}]   ;;  %s613_s5 = inlined_call_operand.vmem [shape: f32[32,128], index: 5, kind: input, shape index: {}]   ;;  %s614_s6 = inlined_call_operand.vmem [shape: f32[1,128], index: 6, kind: input, shape index: {}]   ;;  %s615_s7 = inlined_call_operand.vmem [shape: f32[32,128], index: 7, kind: input, shape index: {}]   ;;  %s616_s8 = inlined_call_operand.vmem [shape: f32[1,128], index: 8, kind: input, shape index: {}]   ;;  %s617_s9 = inlined_call_operand.vmem [shape: f32[128,32], index: 9, kind: input, shape index: {}]   ;;  %s618_s10 = inlined_call_operand.vmem [shape: f32[1,32], index: 10, kind: input, shape index: {}]   ;;  %s619_s11 = inlined_call_operand.hbm [shape: f32[16,32], index: 11, kind: output, shape index: {}]  }
   0x1   :  { %v84_v0 = vld [vmem:[%s613_s5 + $0x18] sm:$0xff]  ;;  %v83_v1 = vld [vmem:[%s613_s5 + $0x10] sm:$0xff]  ;;  %v82_v3 = vld [vmem:[%s613_s5 + $0x8] sm:$0xff] }
   0x2   :  { %107 = vmatpush.msra.mxu2 %v84_v0  ;;  %v44_v2 = vld [vmem:[%s611_s3 + $0x18] sm:$0xff]  ;;  %v81_v4 = vld [vmem:[%s613_s5] sm:$0xff]  ;;  %v43_v5 = vld [vmem:[%s611_s3 + $0x10] sm:$0xff] }
   0x3   :  { %68 = vmatpush.msra.mxu0 %v44_v2  ;;  %v42_v6 = vld [vmem:[%s611_s3 + $0x8] sm:$0xff] }
   0x4   :  { %108 = vmatpush.msra.mxu2 %v83_v1 }
   0x5   :  { %69 = vmatpush.msra.mxu0 %v43_v5 }
   0x6   :  { %16 = vsyncpa [#allocation3], 0  ;;  %109 = vmatpush.msra.mxu2 %v82_v3  ;;  %vm49_vm0 = vcmask 261120   ;;  %v79_v7 = vld [vmem:[%s609_s1] sm:$0xff]  ;;  %v80_v16 = vld [vmem:[%s609_s1 + $0x8] sm:$0xff]  ;;  %vm178_vm1 = vcmask 64512  }
   0x7   :  { %v41_v8 = vld [vmem:[%s611_s3] sm:$0xff]  ;;  %70 = vmatpush.msra.mxu0 %v42_v6  ;;  %v123_v17 = vld [vmem:[%s615_s7 + $0x18] sm:$0xff]  ;;  %v122_v18 = vld [vmem:[%s615_s7 + $0x10] sm:$0xff]  ;;  %s345_s20 = sshll.u32 %s619_s11, 4  ;;  %s407_s3 = smov 128   ;;  %s346_s20 = int_to_ptr.hbm [resolvable:$true] %s345_s20 }
   0x8   :  { %v39_v9 = vld [vmem:[%s608_s0] sm:$0xff]  ;;  %110 = vmatpush.msra.mxu2 %v81_v4  ;;  %v121_v19 = vld [vmem:[%s615_s7 + $0x8] sm:$0xff]  ;;  %v309_v36 = vld [vmem:[%s617_s9 + $0x78] sm:$0xff]  ;;  %s408_s21 = smov 8  }
   0x9   :  { %359 = vmatmul.msk.f32.vlgmr.msra.gmra.mxu2 %vm49_vm0, %v79_v7  ;;  %71 = vmatpush.msra.mxu0 %v41_v8  ;;  %v369_v10 = vld [vmem:[%s614_s6] ss:$0 sm:$0xff]  ;;  %v40_v25 = vld [vmem:[%s608_s0 + $0x8] sm:$0xff]  ;;  %v308_v37 = vld [vmem:[%s617_s9 + $0x70] sm:$0xff] }
   0xa   :  { %357 = vmatmul.msk.f32.vlgmr.msra.gmra.mxu0 %vm49_vm0, %v39_v9  ;;  %v507_v11 = vld [vmem:[%s612_s4] ss:$0 sm:$0xff]  ;;  %146 = vmatpush.msrb.mxu2 %v123_v17  ;;  %v307_v38 = vld [vmem:[%s617_s9 + $0x68] sm:$0xff]  ;;  %v305_v41 = vld [vmem:[%s617_s9 + $0x58] sm:$0xff] }
   0xb   :  { %v120_v20 = vld [vmem:[%s615_s7] sm:$0xff]  ;;  %314 = vmatpush.msra.mxu1 %v309_v36  ;;  %v304_v42 = vld [vmem:[%s617_s9 + $0x50] sm:$0xff]  ;;  %v303_v43 = vld [vmem:[%s617_s9 + $0x48] sm:$0xff] }
   0xc   :  { %147 = vmatpush.msrb.mxu2 %v122_v18  ;;  %v118_v21 = vld [vmem:[%s610_s2] sm:$0xff]  ;;  %v301_v48 = vld [vmem:[%s617_s9 + $0x38] sm:$0xff]  ;;  %v300_v52 = vld [vmem:[%s617_s9 + $0x30] sm:$0xff] }
   0xd   :  { %v538_v27 = vld [vmem:[%s616_s8] ss:$0 sm:$0xff]  ;;  %315 = vmatpush.msra.mxu1 %v308_v37  ;;  %v299_v54 = vld [vmem:[%s617_s9 + $0x28] sm:$0xff]  ;;  %v297_v60 = vld [vmem:[%s617_s9 + $0x18] sm:$0xff] }
   0xe   :  { %148 = vmatpush.msrb.mxu2 %v121_v19  ;;  %v306_v40 = vld [vmem:[%s617_s9 + $0x60] sm:$0xff]  ;;  %v296_v61 = vld [vmem:[%s617_s9 + $0x10] sm:$0xff]  ;;  %v295_v63 = vld [vmem:[%s617_s9 + $0x8] sm:$0xff] }
   0xf   :  { %316 = vmatpush.msra.mxu1 %v307_v38  ;;  %v302_v46 = vld [vmem:[%s617_s9 + $0x40] sm:$0xff]  ;;  %v119_v2 = vld [vmem:[%s610_s2 + $0x8] sm:$0xff]  ;;  %s406_s2 = smov [#allocation2]  }
  0x10   :  { %149 = vmatpush.msrb.mxu2 %v120_v20  ;;  %v298_v57 = vld [vmem:[%s617_s9 + $0x20] sm:$0xff] }
  0x11   :  { %360 = vmatmul.msk.f32.gmra.mxu2 %vm49_vm0, %v80_v16  ;;  %317 = vmatpush.msra.mxu1 %v306_v40  ;;  %v294_v1 = vld [vmem:[%s617_s9] sm:$0xff]  ;;  %s343_s9 = sshll.u32 %s406_s2, 4  ;;  %s344_s9 = int_to_ptr.vmem [resolvable:$true] %s343_s9 }
  0x12   :  { %358 = vmatmul.msk.f32.gmra.mxu0 %vm49_vm0, %v40_v25  ;;  %v371_v7 = vld [vmem:[%s618_s10] ss:$0 sm:$0xff] }
  0x13   :  { %318 = vmatpush.msra.mxu1 %v305_v41 }
  0x15   :  { %319 = vmatpush.msra.mxu1 %v304_v42 }
  0x17   :  { %320 = vmatpush.msra.mxu1 %v303_v43 }
  0x19   :  { %361 = vmatmul.msk.f32.vlgmr.msrb.gmra.mxu2 %vm49_vm0, %v118_v21  ;;  %321 = vmatpush.msra.mxu1 %v302_v46 }
  0x1b   :  { %322 = vmatpush.msra.mxu1 %v301_v48 }
  0x1d   :  { %323 = vmatpush.msra.mxu1 %v300_v52 }
  0x1f   :  { %324 = vmatpush.msra.mxu1 %v299_v54 }
  0x21   :  { %325 = vmatpush.msra.mxu1 %v298_v57  ;;  %362 = vmatmul.msk.f32.gmra.mxu2 %vm49_vm0, %v119_v2 }
  0x23   :  { %326 = vmatpush.msra.mxu1 %v297_v60 }
  0x25   :  { %327 = vmatpush.msra.mxu1 %v296_v61 }
  0x27   :  { %328 = vmatpush.msra.mxu1 %v295_v63 }
  0x29   :  { %329 = vmatpush.msra.mxu1 %v294_v1 }
  0x87   :  { %v73_v12 = vpop.f32.mrf.mxu0 }
  0x88   :  { %v74_v15 = vadd.f32 %v507_v11, %v73_v12 }
  0x8c   :  { %v112_v13 = vpop.f32.mrf.mxu2 }
  0x8d   :  { %v113_v14 = vadd.f32 %v369_v10, %v112_v13 }
  0x8f   :  { %172 = vmatpush.xpose.msra.mxu3 %v113_v14  ;;  %v76_v62 = vpop.f32.mrf.mxu0 }
  0x90   :  { %v77_v0 = vadd.f32 %v507_v11, %v76_v62 }
  0x92   :  { %173 = vmatmul.f32.vlgmr.msra.gmra.mxu3 %v74_v15 }
  0x94   :  { %v115_v26 = vpop.f32.mrf.mxu2 }
  0x95   :  { %v116_v28 = vadd.f32 %v369_v10, %v115_v26 }
  0x9c   :  { %v151_v29 = vpop.f32.mrf.mxu2 }
  0x9d   :  { %v152_v30 = vadd.f32 %v538_v27, %v151_v29 }
  0x9f   :  { %221 = vmatpush.msrb.mxu3 %v152_v30 }
  0xa1   :  { %241 = vmatpush.xpose.msra.mxu3 %v116_v28 }
  0xa4   :  { %v154_v15 = vpop.f32.mrf.mxu2 }
  0xa5   :  { %v155_v16 = vadd.f32 %v538_v27, %v154_v15 }
  0xa7   :  { %289 = vmatpush.msrb.mxu0 %v155_v16 }
 0x115   :  { %v174_v22 = vpop.f32.mrf.mxu3 }
 0x116   :  { %v177_v23 = vmul.f32 0.5, %v174_v22 }
 0x118   :  { %v179_v24 = vsel %vm178_vm1, %v177_v23, -inf }
 0x119   :  { %180 = vmax.xlane.f32.xlu0 %v179_v24 }
 0x18c   :  { %v181_v31 = vpop.xlane.xlu0 %180 }
 0x18d   :  { %v182_v32 = vsub.f32 %v177_v23, %v181_v31 }
 0x18f   :  { %v183_v33 = vmul.f32 1.442695, %v182_v32 }
 0x191   :  { %372 = vpow2.f32 %v183_v33 }
 0x197   :  { %v373_v34 = vpop.eup %372 }
 0x198   :  { %v185_v35 = vsel %vm178_vm1, %v373_v34, 0.0 }
 0x199   :  { %186 = vadd.xlane.f32.xlu0 %v185_v35 }
 0x20c   :  { %v187_v39 = vpop.xlane.xlu0 %186 }
 0x20d   :  { %374 = vrcp.f32 %v187_v39  ;;  %v199_v49 = vand.u32 2147483648, %v187_v39  ;;  %v197_v51 = vand.u32 2147483647, %v187_v39  ;;  %vm193_vm3 = vweird.f32 %v187_v39 }
 0x20f   :  { %v200_v55 = vor.u32 1.1754944e-38, %v199_v49  ;;  %vm198_vm5 = vcmp.eq.f32.partialorder %v197_v51, 8.507059e+37 }
 0x213   :  { %v375_v44 = vpop.eup %374 }
 0x214   :  { %v189_v45 = vmul.f32 %v375_v44, %v187_v39  ;;  %vm194_vm2 = vweird.f32 %v375_v44 }
 0x215   :  { %vm195_vm4 = vmor %vm193_vm3, %vm194_vm2 }
 0x216   :  { %v190_v47 = vsub.f32 1.0, %v189_v45 }
 0x218   :  { %v191_v50 = vmul.f32 %v375_v44, %v190_v47 }
 0x21a   :  { %v192_v53 = vadd.f32 %v375_v44, %v191_v50 }
 0x21c   :  { %v196_v56 = vsel %vm195_vm4, %v375_v44, %v192_v53 }
 0x21d   :  { %v201_v58 = vsel %vm198_vm5, %v200_v55, %v196_v56 }
 0x21e   :  { %v202_v59 = vmul.f32 %v373_v34, %v201_v58 }
 0x220   :  { %363 = vmatmul.msk.f32.vlgmr.msrb.gmra.mxu3 %vm178_vm1, %v202_v59 }
 0x228   :  { %242 = vmatmul.f32.vlgmr.msra.gmra.mxu3 %v77_v0 }
 0x2a3   :  { %v223_v3 = vpop.f32.mrf.mxu3 }
 0x2a4   :  { %330 = vmatmul.f32.vlgmr.msra.gmra.mxu1 %v223_v3 }
 0x2ab   :  { %v243_v4 = vpop.f32.mrf.mxu3 }
 0x2ac   :  { %v246_v5 = vmul.f32 0.5, %v243_v4 }
 0x2ae   :  { %v247_v6 = vsel %vm178_vm1, %v246_v5, -inf }
 0x2af   :  { %248 = vmax.xlane.f32.xlu1 %v247_v6 }
 0x321   :  { %v331_v8 = vpop.f32.mrf.mxu1 }
 0x322   :  { %v332_v9 = vadd.f32 %v371_v7, %v331_v8  ;;  %v249_v10 = vpop.xlane.xlu1 %248 }
 0x323   :  { %v250_v11 = vsub.f32 %v246_v5, %v249_v10 }
 0x324   :  { %337 = vst.msk [vmem:[#allocation2] sm:$0xff] %vm49_vm0, %v332_v9 }
 0x325   :  { %v251_v12 = vmul.f32 1.442695, %v250_v11 }
 0x327   :  { %376 = vpow2.f32 %v251_v12 }
 0x32d   :  { %v377_v13 = vpop.eup %376 }
 0x32e   :  { %v253_v14 = vsel %vm178_vm1, %v377_v13, 0.0 }
 0x32f   :  { %254 = vadd.xlane.f32.xlu1 %v253_v14 }
 0x3a2   :  { %v255_v17 = vpop.xlane.xlu1 %254 }
 0x3a3   :  { %378 = vrcp.f32 %v255_v17  ;;  %v267_v21 = vand.u32 2147483648, %v255_v17  ;;  %v265_v23 = vand.u32 2147483647, %v255_v17  ;;  %vm261_vm7 = vweird.f32 %v255_v17 }
 0x3a5   :  { %v268_v25 = vor.u32 1.1754944e-38, %v267_v21  ;;  %vm266_vm9 = vcmp.eq.f32.partialorder %v265_v23, 8.507059e+37 }
 0x3a9   :  { %v379_v18 = vpop.eup %378 }
 0x3aa   :  { %v257_v19 = vmul.f32 %v379_v18, %v255_v17  ;;  %vm262_vm6 = vweird.f32 %v379_v18 }
 0x3ab   :  { %vm263_vm8 = vmor %vm261_vm7, %vm262_vm6 }
 0x3ac   :  { %v258_v20 = vsub.f32 1.0, %v257_v19 }
 0x3ae   :  { %v259_v22 = vmul.f32 %v379_v18, %v258_v20 }
 0x3b0   :  { %v260_v24 = vadd.f32 %v379_v18, %v259_v22 }
 0x3b2   :  { %v264_v26 = vsel %vm263_vm8, %v379_v18, %v260_v24 }
 0x3b3   :  { %v269_v28 = vsel %vm266_vm9, %v268_v25, %v264_v26 }
 0x3b4   :  { %v270_v29 = vmul.f32 %v377_v13, %v269_v28 }
 0x3b6   :  { %364 = vmatmul.msk.f32.vlgmr.msrb.gmra.mxu0 %vm178_vm1, %v270_v29 }
 0x433   :  { %v291_v27 = vpop.f32.mrf.mxu0 }
 0x434   :  { %333 = vmatmul.f32.gmra.mxu1 %v291_v27 }
 0x4b1   :  { %v334_v30 = vpop.f32.mrf.mxu1 }
 0x4b2   :  { %v335_v31 = vadd.f32 %v371_v7, %v334_v30 }
 0x4b4   :  { %338 = vst.msk [vmem:[#allocation2 + $0x8] sm:$0xff] %vm49_vm0, %v335_v31 }
 0x4b5   :  { %351 = dma.vmem_to_hbm [thread:$0]  %s344_s9, 256, %s346_s20, [#allocation3], %s407_s3, %s407_s3, %s408_s21  }
 0x4b6   :  { %404 = dma.done.wait [#allocation3], 256  }
 0x4b7   :  { %405 = vsyncadd [#allocation3], 4294967040 }
 0x4b8   :  { %356 = vsyncpa [#allocation3], 1 }

</bundles_post_ra>
